<compile_context>
chip_gen: v6e
topology: v6e:2x2x1
jax: 0.10.0
libtpu: 0.0.40
codegen_flags: <defaults>
</compile_context>

<pallas_src>
import math
import functools

import jax
import jax.numpy as jnp
from jax.experimental import pallas as pl
from jax.experimental.pallas import tpu as pltpu


_COMPILER_PARAMS = pltpu.CompilerParams(
    dimension_semantics=("parallel",),
    vmem_limit_bytes=32 * 1024 * 1024,
)


# ----------------------------- kernel helpers --------------------------------

def _layer_norm(z, w, b, eps=1e-5):
    # f32 math (v5e VPU/EUP have no bf16 path)
    mu = jnp.mean(z, axis=-1, keepdims=True)
    var = jnp.mean((z - mu) ** 2, axis=-1, keepdims=True)
    return (z - mu) * jax.lax.rsqrt(var + eps) * w + b


def _gelu_exact(z):
    # nn.GELU() default is the exact erf formulation
    return 0.5 * z * (1.0 + jax.lax.erf(z * (1.0 / math.sqrt(2.0))))


# ----------------------------- kernels ----------------------------------------

def _qkv_kernel(x_ref, ln1_w, ln1_b, wq, wk, wv, bq, bk, bv,
                q_ref, k_ref, v_ref):
    """LN1 + Q/K/V projections over a (TILE_R, E) row tile (rows = B*S folded)."""
    x = x_ref[...]                                    # (TILE_R, E) f32
    xln = _layer_norm(x, ln1_w[...], ln1_b[...])      # f32
    xb = xln.astype(jnp.bfloat16)                     # bf16 MXU inputs
    q = jnp.dot(xb, wq[...], preferred_element_type=jnp.float32) + bq[...]
    k = jnp.dot(xb, wk[...], preferred_element_type=jnp.float32) + bk[...]
    v = jnp.dot(xb, wv[...], preferred_element_type=jnp.float32) + bv[...]
    q_ref[...] = q.astype(q_ref.dtype)
    k_ref[...] = k.astype(k_ref.dtype)
    v_ref[...] = v.astype(v_ref.dtype)


def _attn_kernel(scale, q_ref, k_ref, v_ref, o_ref):
    """Softmax attention over a (TILE_N, S, Dh) block; batch dim = (batch*head)."""
    # TODO(synk): for realistic sequence lengths, tile KV blocks with an
    # online-softmax (flash) loop instead of materializing full (S, S) scores.
    q = q_ref[...]                                    # (TILE_N, S, Dh) bf16
    k = k_ref[...]
    v = v_ref[...]
    s = jnp.einsum("bqd,bkd->bqk", q, k,
                   preferred_element_type=jnp.float32) * scale
    s = s - jnp.max(s, axis=-1, keepdims=True)
    p = jnp.exp(s)
    denom = jnp.sum(p, axis=-1, keepdims=True)
    p = p * pl.reciprocal(denom, approx=True)         # EUP, not VALU divide
    ctx = jnp.einsum("bqk,bkd->bqd", p.astype(v.dtype), v,
                     preferred_element_type=jnp.float32)
    o_ref[...] = ctx.astype(o_ref.dtype)


def _outproj_mlp_kernel(ctx_ref, x_ref, wo, bo, ln2_w, ln2_b, w1, b1, w2, b2,
                        o_ref):
    """Attention output projection + residual + LN2 + MLP + residual (row tile)."""
    ctx = ctx_ref[...]                                # (TILE_R, E) bf16
    x = x_ref[...]                                    # (TILE_R, E) f32
    attn = jnp.dot(ctx, wo[...], preferred_element_type=jnp.float32) + bo[...]
    y = attn + x                                      # residual 1 (f32)
    yln = _layer_norm(y, ln2_w[...], ln2_b[...])
    h1 = jnp.dot(yln.astype(jnp.bfloat16), w1[...],
                 preferred_element_type=jnp.float32) + b1[...]
    g = _gelu_exact(h1)                               # f32 GELU
    h2 = jnp.dot(g.astype(jnp.bfloat16), w2[...],
                 preferred_element_type=jnp.float32) + b2[...]
    o_ref[...] = (h2 + y).astype(o_ref.dtype)         # residual 2


# ----------------------------- wrapper ----------------------------------------

def _row_tile(n):
    # Largest convenient row tile that divides n (>=256 preferred on v6e/v7x).
    for t in (512, 256, 128, 64, 32, 16, 8):
        if t <= n and n % t == 0:
            return t
    return n


def transformer_encoder_block(x, params, num_heads):
    B, S, E = x.shape
    H = num_heads
    Dh = E // H
    R = B * S            # rows folded across batch -> big matmul M dimension
    N = B * H            # (batch, head) pairs -> attention batch dimension
    p = params

    x2 = x.reshape(R, E)

    def full2(arr):
        return pl.BlockSpec(arr.shape, lambda i: (0, 0))

    tile_r = _row_tile(R)
    row_spec = pl.BlockSpec((tile_r, E), lambda i: (i, 0))

    # ---- kernel A: LN1 + QKV projections over folded rows --------------------
    q, k, v = pl.pallas_call(
        _qkv_kernel,
        out_shape=(jax.ShapeDtypeStruct((R, E), jnp.bfloat16),) * 3,
        grid=(R // tile_r,),
        in_specs=[row_spec,
                  full2(p["ln1_w"]), full2(p["ln1_b"]),
                  full2(p["wq_t"]), full2(p["wk_t"]), full2(p["wv_t"]),
                  full2(p["bq"]), full2(p["bk"]), full2(p["bv"])],
        out_specs=(row_spec, row_spec, row_spec),
        compiler_params=_COMPILER_PARAMS,
    )(x2, p["ln1_w"], p["ln1_b"], p["wq_t"], p["wk_t"], p["wv_t"],
      p["bq"], p["bk"], p["bv"])

    # ---- head layout plumbing (XLA side, not in-kernel) -----------------------
    def split_heads(t):          # (R, E) -> (B*H, S, Dh)
        return t.reshape(B, S, H, Dh).transpose(0, 2, 1, 3).reshape(N, S, Dh)

    qh, kh, vh = split_heads(q), split_heads(k), split_heads(v)

    # ---- kernel B: batched-head attention -------------------------------------
    tile_n = N   # all (batch, head) pairs fit comfortably in VMEM at these shapes
    head_spec = pl.BlockSpec((tile_n, S, Dh), lambda n: (n, 0, 0))

    ctx = pl.pallas_call(
        functools.partial(_attn_kernel, 1.0 / math.sqrt(Dh)),
        out_shape=jax.ShapeDtypeStruct((N, S, Dh), jnp.bfloat16),
        grid=(N // tile_n,),
        in_specs=[head_spec, head_spec, head_spec],
        out_specs=head_spec,
        compiler_params=_COMPILER_PARAMS,
    )(qh, kh, vh)

    ctx2 = ctx.reshape(B, H, S, Dh).transpose(0, 2, 1, 3).reshape(R, E)

    # ---- kernel C: out-proj + residual + LN2 + MLP + residual ------------------
    out2 = pl.pallas_call(
        _outproj_mlp_kernel,
        out_shape=jax.ShapeDtypeStruct((R, E), x.dtype),
        grid=(R // tile_r,),
        in_specs=[row_spec, row_spec,
                  full2(p["wo_t"]), full2(p["bo"]),
                  full2(p["ln2_w"]), full2(p["ln2_b"]),
                  full2(p["w1_t"]), full2(p["b1"]),
                  full2(p["w2_t"]), full2(p["b2"])],
        out_specs=row_spec,
        compiler_params=_COMPILER_PARAMS,
    )(ctx2, x2, p["wo_t"], p["bo"], p["ln2_w"], p["ln2_b"],
      p["w1_t"], p["b1"], p["w2_t"], p["b2"])

    return out2.reshape(B, S, E)


# ----------------------------- param init --------------------------------------

def init_params(key, E, M):
    ks = jax.random.split(key, 16)

    def rnd(k, shape, scale=0.02):
        return jax.random.normal(k, shape, jnp.float32) * scale

    # PyTorch nn.MultiheadAttention / nn.Linear weights, stored pre-transposed
    # for x @ W_t; matmul weights stored as bf16 (f32 accumulation in-kernel).
    wq = rnd(ks[0], (E, E)); wk = rnd(ks[1], (E, E)); wv = rnd(ks[2], (E, E))
    wo = rnd(ks[3], (E, E))
    w1 = rnd(ks[4], (M, E))            # nn.Linear(E, M).weight  (M, E)
    w2 = rnd(ks[5], (E, M))            # nn.Linear(M, E).weight  (E, M)

    bf = jnp.bfloat16
    return {
        "ln1_w": jnp.ones((1, E), jnp.float32) + rnd(ks[6], (1, E)),
        "ln1_b": rnd(ks[7], (1, E)),
        "wq_t": wq.T.astype(bf), "wk_t": wk.T.astype(bf), "wv_t": wv.T.astype(bf),
        "bq": rnd(ks[8], (1, E)), "bk": rnd(ks[9], (1, E)), "bv": rnd(ks[10], (1, E)),
        "wo_t": wo.T.astype(bf), "bo": rnd(ks[11], (1, E)),
        "ln2_w": jnp.ones((1, E), jnp.float32) + rnd(ks[12], (1, E)),
        "ln2_b": rnd(ks[13], (1, E)),
        "w1_t": w1.T.astype(bf), "b1": rnd(ks[14], (1, M)),
        "w2_t": w2.T.astype(bf), "b2": rnd(ks[15], (1, E)),
    }


# ----------------------------- pure-JAX reference -------------------------------

def reference(x, p, H):
    B, S, E = x.shape
    Dh = E // H
    f32 = lambda a: a.astype(jnp.float32)

    def ln(z, w, b):
        mu = jnp.mean(z, -1, keepdims=True)
        var = jnp.mean((z - mu) ** 2, -1, keepdims=True)
        return (z - mu) * jax.lax.rsqrt(var + 1e-5) * w + b

    xln = ln(x, p["ln1_w"][0], p["ln1_b"][0])
    q = xln @ f32(p["wq_t"]) + p["bq"][0]
    k = xln @ f32(p["wk_t"]) + p["bk"][0]
    v = xln @ f32(p["wv_t"]) + p["bv"][0]
    q = q.reshape(B, S, H, Dh).transpose(0, 2, 1, 3)
    k = k.reshape(B, S, H, Dh).transpose(0, 2, 1, 3)
    v = v.reshape(B, S, H, Dh).transpose(0, 2, 1, 3)
    s = jnp.einsum("bhqd,bhkd->bhqk", q, k) * (1.0 / math.sqrt(Dh))
    a = jax.nn.softmax(s, axis=-1)
    o = jnp.einsum("bhqk,bhkd->bhqd", a, v).transpose(0, 2, 1, 3).reshape(B, S, E)
    attn = o @ f32(p["wo_t"]) + p["bo"][0]
    y = attn + x
    yln = ln(y, p["ln2_w"][0], p["ln2_b"][0])
    h1 = yln @ f32(p["w1_t"]) + p["b1"][0]
    g = 0.5 * h1 * (1.0 + jax.lax.erf(h1 * (1.0 / math.sqrt(2.0))))
    h2 = g @ f32(p["w2_t"]) + p["b2"][0]
    return h2 + y


# ----------------------------- main ----------------------------------------------

if __name__ == "__main__":
    # Small ViT-like shapes: E a multiple of 128 (lane-dense stores), E % H == 0.
    B, S, E, H, M = 2, 16, 128, 4, 256

    key = jax.random.PRNGKey(0)
    kx, kp = jax.random.split(key)
    x = jax.random.normal(kx, (B, S, E), jnp.float32)
    params = init_params(kp, E, M)

    out = jax.block_until_ready(transformer_encoder_block(x, params, num_heads=H))
    ref = jax.block_until_ready(reference(x, params, H))

    assert out.shape == (B, S, E), out.shape
    assert bool(jnp.isfinite(out).all())
    max_err = float(jnp.max(jnp.abs(out - ref)))
    assert bool(jnp.allclose(out, ref, atol=2e-2, rtol=2e-2)), max_err

    print("KERNEL_OK")
</pallas_src>

<mosaic_0001>
module attributes {stable_mosaic.version = 11 : i64} {
  func.func @_qkv_kernel(%arg0: i32, %arg1: memref<32x128xf32, #tpu.memory_space<vmem>>, %arg2: memref<1x128xf32, #tpu.memory_space<vmem>>, %arg3: memref<1x128xf32, #tpu.memory_space<vmem>>, %arg4: memref<128x128xbf16, #tpu.memory_space<vmem>>, %arg5: memref<128x128xbf16, #tpu.memory_space<vmem>>, %arg6: memref<128x128xbf16, #tpu.memory_space<vmem>>, %arg7: memref<1x128xf32, #tpu.memory_space<vmem>>, %arg8: memref<1x128xf32, #tpu.memory_space<vmem>>, %arg9: memref<1x128xf32, #tpu.memory_space<vmem>>, %arg10: memref<32x128xbf16, #tpu.memory_space<vmem>>, %arg11: memref<32x128xbf16, #tpu.memory_space<vmem>>, %arg12: memref<32x128xbf16, #tpu.memory_space<vmem>>) attributes {dimension_semantics = [#tpu.dimension_semantics<parallel>], iteration_bounds = array<i64: 1>, scalar_prefetch = 0 : i64, scratch_operands = 0 : i64, tpu.core_type = #tpu.core_type<tc>, window_params = [{transform_indices = @transform_0, window_bounds = array<i64: 32, 128>}, {pipeline_mode = #tpu.pipeline_mode<synchronous>, transform_indices = @transform_1, window_bounds = array<i64: 1, 128>}, {pipeline_mode = #tpu.pipeline_mode<synchronous>, transform_indices = @transform_2, window_bounds = array<i64: 1, 128>}, {pipeline_mode = #tpu.pipeline_mode<synchronous>, transform_indices = @transform_3, window_bounds = array<i64: 128, 128>}, {pipeline_mode = #tpu.pipeline_mode<synchronous>, transform_indices = @transform_4, window_bounds = array<i64: 128, 128>}, {pipeline_mode = #tpu.pipeline_mode<synchronous>, transform_indices = @transform_5, window_bounds = array<i64: 128, 128>}, {pipeline_mode = #tpu.pipeline_mode<synchronous>, transform_indices = @transform_6, window_bounds = array<i64: 1, 128>}, {pipeline_mode = #tpu.pipeline_mode<synchronous>, transform_indices = @transform_7, window_bounds = array<i64: 1, 128>}, {pipeline_mode = #tpu.pipeline_mode<synchronous>, transform_indices = @transform_8, window_bounds = array<i64: 1, 128>}, {transform_indices = @transform_9, window_bounds = array<i64: 32, 128>}, {transform_indices = @transform_10, window_bounds = array<i64: 32, 128>}, {transform_indices = @transform_11, window_bounds = array<i64: 32, 128>}]} {
    %c0 = arith.constant 0 : index
    %c0_0 = arith.constant 0 : index
    %0 = vector.load %arg1[%c0, %c0_0] : memref<32x128xf32, #tpu.memory_space<vmem>>, vector<32x128xf32>
    %c0_1 = arith.constant 0 : index
    %c0_2 = arith.constant 0 : index
    %1 = vector.load %arg2[%c0_1, %c0_2] : memref<1x128xf32, #tpu.memory_space<vmem>>, vector<1x128xf32>
    %c0_3 = arith.constant 0 : index
    %c0_4 = arith.constant 0 : index
    %2 = vector.load %arg3[%c0_3, %c0_4] : memref<1x128xf32, #tpu.memory_space<vmem>>, vector<1x128xf32>
    %cst = arith.constant dense<0.000000e+00> : vector<32xf32>
    %3 = vector.multi_reduction <add>, %0, %cst [1] : vector<32x128xf32> to vector<32xf32>
    %4 = vector.shape_cast %3 : vector<32xf32> to vector<32x1xf32>
    %cst_5 = arith.constant 1.280000e+02 : f32
    %5 = vector.broadcast %cst_5 : f32 to vector<32x1xf32>
    %6 = arith.divf %4, %5 : vector<32x1xf32>
    %7 = vector.broadcast %6 : vector<32x1xf32> to vector<32x128xf32>
    %8 = arith.subf %0, %7 : vector<32x128xf32>
    %9 = arith.mulf %8, %8 : vector<32x128xf32>
    %cst_6 = arith.constant dense<0.000000e+00> : vector<32xf32>
    %10 = vector.multi_reduction <add>, %9, %cst_6 [1] : vector<32x128xf32> to vector<32xf32>
    %11 = vector.shape_cast %10 : vector<32xf32> to vector<32x1xf32>
    %cst_7 = arith.constant 1.280000e+02 : f32
    %12 = vector.broadcast %cst_7 : f32 to vector<32x1xf32>
    %13 = arith.divf %11, %12 : vector<32x1xf32>
    %14 = vector.broadcast %6 : vector<32x1xf32> to vector<32x128xf32>
    %15 = arith.subf %0, %14 : vector<32x128xf32>
    %cst_8 = arith.constant 9.99999974E-6 : f32
    %16 = vector.broadcast %cst_8 : f32 to vector<32x1xf32>
    %17 = arith.addf %13, %16 : vector<32x1xf32>
    %18 = math.rsqrt %17 : vector<32x1xf32>
    %19 = vector.broadcast %18 : vector<32x1xf32> to vector<32x128xf32>
    %20 = arith.mulf %15, %19 : vector<32x128xf32>
    %21 = vector.broadcast %1 : vector<1x128xf32> to vector<32x128xf32>
    %22 = arith.mulf %20, %21 : vector<32x128xf32>
    %23 = vector.broadcast %2 : vector<1x128xf32> to vector<32x128xf32>
    %24 = arith.addf %22, %23 : vector<32x128xf32>
    %25 = arith.truncf %24 : vector<32x128xf32> to vector<32x128xbf16>
    %c0_9 = arith.constant 0 : index
    %c0_10 = arith.constant 0 : index
    %26 = vector.load %arg4[%c0_9, %c0_10] : memref<128x128xbf16, #tpu.memory_space<vmem>>, vector<128x128xbf16>
    %cst_11 = arith.constant dense<0.000000e+00> : vector<32x128xf32>
    %27 = tpu.matmul %25, %26, %cst_11 {dimension_numbers = #tpu.dot_dimension_numbers<[1], [0], [0], [1], [0, 0, 1, 1], [], []>} : vector<32x128xbf16>, vector<128x128xbf16>, vector<32x128xf32> -> vector<32x128xf32>
    %c0_12 = arith.constant 0 : index
    %c0_13 = arith.constant 0 : index
    %28 = vector.load %arg7[%c0_12, %c0_13] : memref<1x128xf32, #tpu.memory_space<vmem>>, vector<1x128xf32>
    %29 = vector.broadcast %28 : vector<1x128xf32> to vector<32x128xf32>
    %30 = arith.addf %27, %29 : vector<32x128xf32>
    %c0_14 = arith.constant 0 : index
    %c0_15 = arith.constant 0 : index
    %31 = vector.load %arg5[%c0_14, %c0_15] : memref<128x128xbf16, #tpu.memory_space<vmem>>, vector<128x128xbf16>
    %cst_16 = arith.constant dense<0.000000e+00> : vector<32x128xf32>
    %32 = tpu.matmul %25, %31, %cst_16 {dimension_numbers = #tpu.dot_dimension_numbers<[1], [0], [0], [1], [0, 0, 1, 1], [], []>} : vector<32x128xbf16>, vector<128x128xbf16>, vector<32x128xf32> -> vector<32x128xf32>
    %c0_17 = arith.constant 0 : index
    %c0_18 = arith.constant 0 : index
    %33 = vector.load %arg8[%c0_17, %c0_18] : memref<1x128xf32, #tpu.memory_space<vmem>>, vector<1x128xf32>
    %34 = vector.broadcast %33 : vector<1x128xf32> to vector<32x128xf32>
    %35 = arith.addf %32, %34 : vector<32x128xf32>
    %c0_19 = arith.constant 0 : index
    %c0_20 = arith.constant 0 : index
    %36 = vector.load %arg6[%c0_19, %c0_20] : memref<128x128xbf16, #tpu.memory_space<vmem>>, vector<128x128xbf16>
    %cst_21 = arith.constant dense<0.000000e+00> : vector<32x128xf32>
    %37 = tpu.matmul %25, %36, %cst_21 {dimension_numbers = #tpu.dot_dimension_numbers<[1], [0], [0], [1], [0, 0, 1, 1], [], []>} : vector<32x128xbf16>, vector<128x128xbf16>, vector<32x128xf32> -> vector<32x128xf32>
    %c0_22 = arith.constant 0 : index
    %c0_23 = arith.constant 0 : index
    %38 = vector.load %arg9[%c0_22, %c0_23] : memref<1x128xf32, #tpu.memory_space<vmem>>, vector<1x128xf32>
    %39 = vector.broadcast %38 : vector<1x128xf32> to vector<32x128xf32>
    %40 = arith.addf %37, %39 : vector<32x128xf32>
    %41 = arith.truncf %30 : vector<32x128xf32> to vector<32x128xbf16>
    %c0_24 = arith.constant 0 : index
    %c0_25 = arith.constant 0 : index
    %42 = vector.load %arg10[%c0_24, %c0_25] : memref<32x128xbf16, #tpu.memory_space<vmem>>, vector<32x128xbf16>
    tpu.vector_store %arg10[%c0_24, %c0_25], %41 {strides = array<i32>} : memref<32x128xbf16, #tpu.memory_space<vmem>>, vector<32x128xbf16>,
    %43 = arith.truncf %35 : vector<32x128xf32> to vector<32x128xbf16>
    %c0_26 = arith.constant 0 : index
    %c0_27 = arith.constant 0 : index
    %44 = vector.load %arg11[%c0_26, %c0_27] : memref<32x128xbf16, #tpu.memory_space<vmem>>, vector<32x128xbf16>
    tpu.vector_store %arg11[%c0_26, %c0_27], %43 {strides = array<i32>} : memref<32x128xbf16, #tpu.memory_space<vmem>>, vector<32x128xbf16>,
    %45 = arith.truncf %40 : vector<32x128xf32> to vector<32x128xbf16>
    %c0_28 = arith.constant 0 : index
    %c0_29 = arith.constant 0 : index
    %46 = vector.load %arg12[%c0_28, %c0_29] : memref<32x128xbf16, #tpu.memory_space<vmem>>, vector<32x128xbf16>
    tpu.vector_store %arg12[%c0_28, %c0_29], %45 {strides = array<i32>} : memref<32x128xbf16, #tpu.memory_space<vmem>>, vector<32x128xbf16>,
    return
  }
  func.func @transform_0(%arg0: i32) -> (i32, i32) {
    %c0_i32 = arith.constant 0 : i32
    %c0_i32_0 = arith.constant 0 : i32
    return %arg0, %c0_i32 : i32, i32
  }
  func.func @transform_1(%arg0: i32) -> (i32, i32) {
    %c0_i32 = arith.constant 0 : i32
    %c0_i32_0 = arith.constant 0 : i32
    %c0_i32_1 = arith.constant 0 : i32
    return %c0_i32, %c0_i32_0 : i32, i32
  }
  func.func @transform_2(%arg0: i32) -> (i32, i32) {
    %c0_i32 = arith.constant 0 : i32
    %c0_i32_0 = arith.constant 0 : i32
    %c0_i32_1 = arith.constant 0 : i32
    return %c0_i32, %c0_i32_0 : i32, i32
  }
  func.func @transform_3(%arg0: i32) -> (i32, i32) {
    %c0_i32 = arith.constant 0 : i32
    %c0_i32_0 = arith.constant 0 : i32
    %c0_i32_1 = arith.constant 0 : i32
    return %c0_i32, %c0_i32_0 : i32, i32
  }
  func.func @transform_4(%arg0: i32) -> (i32, i32) {
    %c0_i32 = arith.constant 0 : i32
    %c0_i32_0 = arith.constant 0 : i32
    %c0_i32_1 = arith.constant 0 : i32
    return %c0_i32, %c0_i32_0 : i32, i32
  }
  func.func @transform_5(%arg0: i32) -> (i32, i32) {
    %c0_i32 = arith.constant 0 : i32
    %c0_i32_0 = arith.constant 0 : i32
    %c0_i32_1 = arith.constant 0 : i32
    return %c0_i32, %c0_i32_0 : i32, i32
  }
  func.func @transform_6(%arg0: i32) -> (i32, i32) {
    %c0_i32 = arith.constant 0 : i32
    %c0_i32_0 = arith.constant 0 : i32
    %c0_i32_1 = arith.constant 0 : i32
    return %c0_i32, %c0_i32_0 : i32, i32
  }
  func.func @transform_7(%arg0: i32) -> (i32, i32) {
    %c0_i32 = arith.constant 0 : i32
    %c0_i32_0 = arith.constant 0 : i32
    %c0_i32_1 = arith.constant 0 : i32
    return %c0_i32, %c0_i32_0 : i32, i32
  }
  func.func @transform_8(%arg0: i32) -> (i32, i32) {
    %c0_i32 = arith.constant 0 : i32
    %c0_i32_0 = arith.constant 0 : i32
    %c0_i32_1 = arith.constant 0 : i32
    return %c0_i32, %c0_i32_0 : i32, i32
  }
  func.func @transform_9(%arg0: i32) -> (i32, i32) {
    %c0_i32 = arith.constant 0 : i32
    %c0_i32_0 = arith.constant 0 : i32
    return %arg0, %c0_i32 : i32, i32
  }
  func.func @transform_10(%arg0: i32) -> (i32, i32) {
    %c0_i32 = arith.constant 0 : i32
    %c0_i32_0 = arith.constant 0 : i32
    return %arg0, %c0_i32 : i32, i32
  }
  func.func @transform_11(%arg0: i32) -> (i32, i32) {
    %c0_i32 = arith.constant 0 : i32
    %c0_i32_0 = arith.constant 0 : i32
    return %arg0, %c0_i32 : i32, i32
  }
}

</mosaic_0001>

<bundles_post_ra>
// kernel: tpu_custom_call.1
= control target key start
LH: loop header
LB: loop body
LE: loop exit
PB: predicated region body
PF: predicated region fallthrough
CT: control target
= control target key end

     0   :  { %17 = vsyncpa [#allocation3], 0  ;;  %s1150_s0 = inlined_call_operand.hbm [shape: f32[32,128], index: 0, kind: input, shape index: {}]   ;;  %s1151_s1 = inlined_call_operand.vmem [shape: f32[1,128], index: 1, kind: input, shape index: {}]   ;;  %s1152_s2 = inlined_call_operand.vmem [shape: f32[1,128], index: 2, kind: input, shape index: {}]   ;;  %s1153_s3 = inlined_call_operand.hbm [shape: bf16[128,128], index: 3, kind: input, shape index: {}]   ;;  %s1154_s4 = inlined_call_operand.hbm [shape: bf16[128,128], index: 4, kind: input, shape index: {}]   ;;  %s1155_s5 = inlined_call_operand.hbm [shape: bf16[128,128], index: 5, kind: input, shape index: {}]   ;;  %s1156_s6 = inlined_call_operand.vmem [shape: f32[1,128], index: 6, kind: input, shape index: {}]   ;;  %s1157_s7 = inlined_call_operand.vmem [shape: f32[1,128], index: 7, kind: input, shape index: {}]   ;;  %s1158_s8 = inlined_call_operand.vmem [shape: f32[1,128], index: 8, kind: input, shape index: {}]   ;;  %s1159_s9 = inlined_call_operand.hbm [shape: bf16[32,128], index: 9, kind: output, shape index: {0}]   ;;  %s1160_s10 = inlined_call_operand.hbm [shape: bf16[32,128], index: 10, kind: output, shape index: {1}]   ;;  %s1161_s11 = inlined_call_operand.hbm [shape: bf16[32,128], index: 11, kind: output, shape index: {2}]  }
   0x1   :  { %18 = vsyncpa [#allocation6], 0 }
   0x2   :  { %19 = vsyncpa [#allocation9], 0 }
   0x3   :  { %20 = vsyncpa [#allocation4], 0 }
   0x4   :  { %21 = vsyncpa [#allocation12], 0  ;;  %s1005_s17 = smov [#allocation5]  }
   0x5   :  { %s43_s18 = sshll.u32 %s1005_s17, 4  ;;  %s44_s18 = int_to_ptr.vmem [resolvable:$true] %s43_s18 }
   0x6   :  { %s863_s19 = scalar_lea.vmem %s44_s18, 1024  ;;  %p868_p1 = scmp.lt.s32.totalorder %s44_s18, %s44_s18 }
   0x7   :  { %p864_p0 = scmp.ne.s32.totalorder %s44_s18, %s863_s19  ;;  %p869_p2 = scmp.lt.s32.totalorder %s863_s19, %s863_s19 }
   0x9   :  { %p870_p3 = por %p869_p2, %p868_p1 }
   0xb   :  { %p871_p4 = pnand %p870_p3, %p864_p0 }
   0xd   :  { %874 = shalt.err (!%p871_p4)
}
   0xe   :  { %s1006_s20 = smov 64   ;;  %s1007_s21 = smov 4  }
   0xf   :  { %49 = dma.hbm_to_vmem [thread:$0]  %s1153_s3, 1024, %s44_s18, [#allocation6], %s1006_s20, %s1006_s20, %s1007_s21  }
  0x10   :  { %s1008_s24 = smov [#allocation2]  }
  0x11   :  { %s27_s25 = sshll.u32 %s1008_s24, 4  ;;  %s28_s25 = int_to_ptr.vmem [resolvable:$true] %s27_s25 }
  0x12   :  { %s883_s26 = scalar_lea.vmem %s28_s25, 512  ;;  %p888_p6 = scmp.lt.s32.totalorder %s28_s25, %s28_s25 }
  0x13   :  { %p884_p5 = scmp.ne.s32.totalorder %s28_s25, %s883_s26  ;;  %p889_p7 = scmp.lt.s32.totalorder %s883_s26, %s883_s26 }
  0x15   :  { %p890_p8 = por %p889_p7, %p888_p6 }
  0x17   :  { %p891_p9 = pnand %p890_p8, %p884_p5 }
  0x19   :  { %894 = shalt.err (!%p891_p9)
}
  0x1a   :  { %s1009_s27 = smov 128   ;;  %s1010_s28 = smov 8  }
  0x1b   :  { %33 = dma.hbm_to_vmem [thread:$0]  %s1150_s0, 512, %s28_s25, [#allocation3], %s1009_s27, %s1009_s27, %s1010_s28  }
  0x1c   :  { %s1011_s12 = smov [#allocation7]   ;;  %s1012_s14 = smov [#allocation8]  }
  0x1d   :  { %s55_s13 = sshll.u32 %s1011_s12, 4  ;;  %s67_s3 = sshll.u32 %s1012_s14, 4  ;;  %s56_s13 = int_to_ptr.vmem [resolvable:$true] %s55_s13  ;;  %s68_s3 = int_to_ptr.vmem [resolvable:$true] %s67_s3 }
  0x1e   :  { %s903_s15 = scalar_lea.vmem %s56_s13, 1024  ;;  %p908_p11 = scmp.lt.s32.totalorder %s56_s13, %s56_s13 }
  0x1f   :  { %p904_p10 = scmp.ne.s32.totalorder %s56_s13, %s903_s15  ;;  %p909_p12 = scmp.lt.s32.totalorder %s903_s15, %s903_s15 }
  0x21   :  { %p910_p13 = por %p909_p12, %p908_p11 }
  0x23   :  { %p911_p0 = pnand %p910_p13, %p904_p10 }
  0x25   :  { %914 = shalt.err (!%p911_p0)
}
  0x26   :  { %61 = dma.hbm_to_vmem [thread:$0]  %s1154_s4, 1024, %s56_s13, [#allocation6], %s1006_s20, %s1006_s20, %s1007_s21  }
  0x27   :  { %s923_s0 = scalar_lea.vmem %s68_s3, 1024  ;;  %p928_p2 = scmp.lt.s32.totalorder %s68_s3, %s68_s3 }
  0x28   :  { %p924_p1 = scmp.ne.s32.totalorder %s68_s3, %s923_s0  ;;  %p929_p3 = scmp.lt.s32.totalorder %s923_s0, %s923_s0 }
  0x2a   :  { %p930_p4 = por %p929_p3, %p928_p2 }
  0x2c   :  { %p931_p5 = pnand %p930_p4, %p924_p1 }
  0x2e   :  { %934 = shalt.err (!%p931_p5)
}
  0x2f   :  { %73 = dma.hbm_to_vmem [thread:$0]  %s1155_s5, 1024, %s68_s3, [#allocation9], %s1006_s20, %s1006_s20, %s1007_s21  }
  0x30   :  { %995 = dma.done.wait [#allocation3], 512  }
  0x31   :  { %996 = vsyncadd [#allocation3], 4294966784 }
  0x32   :  { %997 = dma.done.wait [#allocation6], 2048  }
  0x33   :  { %998 = vsyncadd [#allocation6], 4294965248 }
  0x34   :  { %999 = dma.done.wait [#allocation9], 1024  }
  0x35   :  { %1000 = vsyncadd [#allocation9], 4294966272  ;;  %v93_v0 = vld [vmem:[#allocation2] sm:$0xff]  ;;  %v95_v1 = vld [vmem:[#allocation2 + $0x10] sm:$0xff]  ;;  %s1013_s26 = smov [#allocation11]  }
  0x36   :  { %v94_v2 = vld [vmem:[#allocation2 + $0x8] sm:$0xff]  ;;  %99 = vadd.xlane.f32.xlu0 %v93_v0  ;;  %103 = vadd.xlane.f32.xlu1 %v95_v1  ;;  %v96_v3 = vld [vmem:[#allocation2 + $0x18] sm:$0xff]  ;;  %v825_v22 = vld [vmem:[#allocation5 + $0x30] sm:$0xff]   ;;  %s603_s27 = sshll.u32 %s1013_s26, 4  ;;  %s604_s27 = int_to_ptr.vmem [resolvable:$true] %s603_s27 }
  0x37   :  { %v823_v20 = vld [vmem:[#allocation5 + $0x38] sm:$0xff]   ;;  %v826_v23 = vld [vmem:[#allocation7 + $0x30] sm:$0xff]   ;;  %v827_v24 = vld [vmem:[#allocation5 + $0x28] sm:$0xff]   ;;  %s935_s28 = scalar_lea.vmem %s604_s27, 256  ;;  %p940_p7 = scmp.lt.s32.totalorder %s604_s27, %s604_s27 }
  0x38   :  { %v824_v21 = vld [vmem:[#allocation7 + $0x38] sm:$0xff]   ;;  %752 = vmatprep.subr.bf16.mxu0 %v823_v20  ;;  %v828_v25 = vld [vmem:[#allocation7 + $0x28] sm:$0xff]   ;;  %v829_v26 = vld [vmem:[#allocation5 + $0x20] sm:$0xff]   ;;  %p936_p6 = scmp.ne.s32.totalorder %s604_s27, %s935_s28  ;;  %p941_p8 = scmp.lt.s32.totalorder %s935_s28, %s935_s28 }
  0x39   :  { %753 = vmatpush3.bf16.msra.mxu0 %v823_v20  ;;  %772 = vmatprep.subr.bf16.mxu1 %v824_v21  ;;  %v830_v27 = vld [vmem:[#allocation7 + $0x20] sm:$0xff]   ;;  %v831_v28 = vld [vmem:[#allocation5 + $0x18] sm:$0xff]   ;;  %v833_v30 = vld [vmem:[#allocation5 + $0x10] sm:$0xff]  }
  0x3a   :  { %101 = vadd.xlane.f32.xlu0 %v94_v2  ;;  %105 = vadd.xlane.f32.xlu1 %v96_v3  ;;  %v832_v29 = vld [vmem:[#allocation7 + $0x18] sm:$0xff]   ;;  %v834_v31 = vld [vmem:[#allocation7 + $0x10] sm:$0xff]   ;;  %v835_v32 = vld [vmem:[#allocation5 + $0x8] sm:$0xff]   ;;  %p942_p9 = por %p941_p8, %p940_p7 }
  0x3b   :  { %773 = vmatpush3.bf16.msra.mxu1 %v824_v21  ;;  %754 = vmatprep.subr.bf16.mxu0 %v825_v22  ;;  %v836_v33 = vld [vmem:[#allocation7 + $0x8] sm:$0xff]   ;;  %v837_v34 = vld [vmem:[#allocation5] sm:$0xff]   ;;  %v839_v36 = vld [vmem:[#allocation8 + $0x38] sm:$0xff]  }
  0x3c   :  { %774 = vmatprep.subr.bf16.mxu1 %v826_v23  ;;  %v838_v35 = vld [vmem:[#allocation7] sm:$0xff]   ;;  %p943_p10 = pnand %p942_p9, %p936_p6 }
  0x3d   :  { %755 = vmatpush3.bf16.msra.mxu0 %v825_v22  ;;  %v636_v51 = vld [vmem:[%s1151_s1] ss:$0 sm:$0xff] }
  0x3e   :  { %756 = vmatprep.subr.bf16.mxu0 %v827_v24  ;;  %v637_v56 = vld [vmem:[%s1152_s2] ss:$0 sm:$0xff] }
  0x3f   :  { %775 = vmatpush3.bf16.msra.mxu1 %v826_v23 }
  0x40   :  { %776 = vmatprep.subr.bf16.mxu1 %v828_v25 }
  0x41   :  { %757 = vmatpush3.bf16.msra.mxu0 %v827_v24 }
  0x42   :  { %758 = vmatprep.subr.bf16.mxu0 %v829_v26 }
  0x43   :  { %777 = vmatpush3.bf16.msra.mxu1 %v828_v25 }
  0x44   :  { %778 = vmatprep.subr.bf16.mxu1 %v830_v27 }
  0x45   :  { %759 = vmatpush3.bf16.msra.mxu0 %v829_v26 }
  0x46   :  { %760 = vmatprep.subr.bf16.mxu0 %v831_v28 }
  0x47   :  { %779 = vmatpush3.bf16.msra.mxu1 %v830_v27 }
  0x48   :  { %780 = vmatprep.subr.bf16.mxu1 %v832_v29 }
  0x49   :  { %761 = vmatpush3.bf16.msra.mxu0 %v831_v28 }
  0x4a   :  { %762 = vmatprep.subr.bf16.mxu0 %v833_v30 }
  0x4b   :  { %781 = vmatpush3.bf16.msra.mxu1 %v832_v29 }
  0x4c   :  { %782 = vmatprep.subr.bf16.mxu1 %v834_v31 }
  0x4d   :  { %763 = vmatpush3.bf16.msra.mxu0 %v833_v30 }
  0x4e   :  { %764 = vmatprep.subr.bf16.mxu0 %v835_v32 }
  0x4f   :  { %783 = vmatpush3.bf16.msra.mxu1 %v834_v31 }
  0x50   :  { %784 = vmatprep.subr.bf16.mxu1 %v836_v33 }
  0x51   :  { %765 = vmatpush3.bf16.msra.mxu0 %v835_v32 }
  0x52   :  { %766 = vmatprep.subr.bf16.mxu0 %v837_v34 }
  0x53   :  { %785 = vmatpush3.bf16.msra.mxu1 %v836_v33 }
  0x54   :  { %786 = vmatprep.subr.bf16.mxu1 %v838_v35 }
  0x55   :  { %767 = vmatpush3.bf16.msra.mxu0 %v837_v34 }
  0x56   :  { %792 = vmatprep.subr.bf16.mxu0 %v839_v36 }
  0x57   :  { %787 = vmatpush3.bf16.msra.mxu1 %v838_v35 }
  0xbf   :  { %v100_v4 = vpop.xlane.xlu0 %99  ;;  %v104_v5 = vpop.xlane.xlu1 %103 }
  0xc0   :  { %v108_v6 = vmul.f32 0.0078125, %v100_v4  ;;  %v110_v7 = vmul.f32 0.0078125, %v104_v5  ;;  %v840_v5 = vld [vmem:[#allocation8 + $0x30] sm:$0xff]  }
  0xc2   :  { %v1097_v8 = vsub.f32 %v93_v0, %v108_v6  ;;  %v1099_v9 = vsub.f32 %v95_v1, %v110_v7  ;;  %v841_v6 = vld [vmem:[#allocation8 + $0x28] sm:$0xff]   ;;  %v842_v7 = vld [vmem:[#allocation8 + $0x20] sm:$0xff]  }
  0xc3   :  { %v102_v10 = vpop.xlane.xlu0 %101  ;;  %v106_v11 = vpop.xlane.xlu1 %105 }
  0xc4   :  { %v109_v12 = vmul.f32 0.0078125, %v102_v10  ;;  %v116_v13 = vmul.f32 %v1097_v8, %v1097_v8  ;;  %v111_v14 = vmul.f32 0.0078125, %v106_v11  ;;  %v118_v17 = vmul.f32 %v1099_v9, %v1099_v9  ;;  %v845_v10 = vld [vmem:[#allocation8 + $0x8] sm:$0xff]   ;;  %v846_v11 = vld [vmem:[#allocation8] sm:$0xff]  }
  0xc6   :  { %v1103_v15 = vsub.f32 %v94_v2, %v109_v12  ;;  %120 = vadd.xlane.f32.xlu0 %v116_v13  ;;  %v1105_v16 = vsub.f32 %v96_v3, %v111_v14  ;;  %v638_v14 = vld [vmem:[%s1156_s6] ss:$0 sm:$0xff]  ;;  %s1014_s6 = smov [#allocation10]  }
  0xc8   :  { %v117_v18 = vmul.f32 %v1103_v15, %v1103_v15  ;;  %v119_v19 = vmul.f32 %v1105_v16, %v1105_v16 }
  0xca   :  { %124 = vadd.xlane.f32.xlu0 %v118_v17  ;;  %122 = vadd.xlane.f32.xlu1 %v117_v18 }
  0xce   :  { %126 = vadd.xlane.f32.xlu1 %v119_v19 }
 0x14f   :  { %v121_v37 = vpop.xlane.xlu0 %120 }
 0x150   :  { %v128_v38 = vmul.f32 0.0078125, %v121_v37 }
 0x152   :  { %v132_v39 = vadd.f32 1e-05, %v128_v38 }
 0x153   :  { %v123_v40 = vpop.xlane.xlu1 %122  ;;  %v125_v41 = vpop.xlane.xlu0 %124 }
 0x154   :  { %847 = vrsqrt.f32 %v132_v39  ;;  %v129_v42 = vmul.f32 0.0078125, %v123_v40  ;;  %v130_v43 = vmul.f32 0.0078125, %v125_v41 }
 0x156   :  { %v133_v44 = vadd.f32 1e-05, %v129_v42  ;;  %v134_v45 = vadd.f32 1e-05, %v130_v43 }
 0x157   :  { %v127_v46 = vpop.xlane.xlu1 %126 }
 0x158   :  { %849 = vrsqrt.f32 %v133_v44  ;;  %v131_v47 = vmul.f32 0.0078125, %v127_v46 }
 0x159   :  { %851 = vrsqrt.f32 %v134_v45 }
 0x15a   :  { %v135_v48 = vadd.f32 1e-05, %v131_v47 }
 0x15c   :  { %853 = vrsqrt.f32 %v135_v48 }
 0x161   :  { %v848_v49 = vpop.eup %847 }
 0x162   :  { %v140_v50 = vmul.f32 %v848_v49, %v1097_v8  ;;  %v843_v8 = vld [vmem:[#allocation8 + $0x18] sm:$0xff]  }
 0x164   :  { %v150_v55 = vmul.f32 %v636_v51, %v140_v50 }
 0x165   :  { %v850_v52 = vpop.eup %849 }
 0x166   :  { %v852_v53 = vpop.eup %851  ;;  %v141_v54 = vmul.f32 %v850_v52, %v1103_v15  ;;  %v160_v60 = vadd.f32 %v637_v56, %v150_v55  ;;  %v647_v15 = vld [vmem:[%s1157_s7] ss:$0 sm:$0xff]  ;;  %s591_s7 = sshll.u32 %s1014_s6, 4  ;;  %s592_s7 = int_to_ptr.vmem [resolvable:$true] %s591_s7 }
 0x167   :  { %v142_v57 = vmul.f32 %v852_v53, %v1099_v9  ;;  %v844_v9 = vld [vmem:[#allocation8 + $0x10] sm:$0xff]  }
 0x168   :  { %v151_v58 = vmul.f32 %v636_v51, %v141_v54 }
 0x169   :  { %v854_v59 = vpop.eup %853  ;;  %v152_v63 = vmul.f32 %v636_v51, %v142_v57 }
 0x16a   :  { %v161_v61 = vadd.f32 %v637_v56, %v151_v58  ;;  %v143_v62 = vmul.f32 %v854_v59, %v1105_v16 }
 0x16b   :  { %v162_v2 = vadd.f32 %v637_v56, %v152_v63 }
 0x16c   :  { %v164_v0 = vpack.c.bf16 %v161_v61, %v160_v60  ;;  %v153_v1 = vmul.f32 %v636_v51, %v143_v62 }
 0x16e   :  { %768 = vmatprep.mubr.bf16.mxu0 %v164_v0  ;;  %788 = vmatprep.mubr.bf16.mxu1 %v164_v0  ;;  %v163_v3 = vadd.f32 %v637_v56, %v153_v1 }
 0x170   :  { %v165_v4 = vpack.c.bf16 %v163_v3, %v162_v2 }
 0x172   :  { %769 = vmatmul.mubr.bf16.vlgmr.msra.gmra.mxu0 %v165_v4  ;;  %789 = vmatmul.mubr.bf16.vlgmr.msra.gmra.mxu1 %v165_v4 }
 0x173   :  { %793 = vmatpush3.bf16.msra.mxu0 %v839_v36  ;;  %808 = vmatprep.mubr.bf16.mxu0 %v164_v0 }
 0x174   :  { %794 = vmatprep.subr.bf16.mxu0 %v840_v5 }
 0x177   :  { %795 = vmatpush3.bf16.msra.mxu0 %v840_v5 }
 0x178   :  { %796 = vmatprep.subr.bf16.mxu0 %v841_v6 }
 0x17b   :  { %797 = vmatpush3.bf16.msra.mxu0 %v841_v6 }
 0x17c   :  { %798 = vmatprep.subr.bf16.mxu0 %v842_v7 }
 0x17f   :  { %799 = vmatpush3.bf16.msra.mxu0 %v842_v7 }
 0x180   :  { %800 = vmatprep.subr.bf16.mxu0 %v843_v8 }
 0x183   :  { %801 = vmatpush3.bf16.msra.mxu0 %v843_v8 }
 0x184   :  { %802 = vmatprep.subr.bf16.mxu0 %v844_v9 }
 0x187   :  { %803 = vmatpush3.bf16.msra.mxu0 %v844_v9 }
 0x188   :  { %804 = vmatprep.subr.bf16.mxu0 %v845_v10 }
 0x18b   :  { %805 = vmatpush3.bf16.msra.mxu0 %v845_v10 }
 0x18c   :  { %806 = vmatprep.subr.bf16.mxu0 %v846_v11 }
 0x18f   :  { %807 = vmatpush3.bf16.msra.mxu0 %v846_v11 }
 0x192   :  { %809 = vmatmul.mubr.bf16.vlgmr.msra.gmra.mxu0 %v165_v4 }
 0x232   :  { %v770_v12 = vpop.f32.mrf.mxu0  ;;  %v790_v13 = vpop.f32.mrf.mxu1 }
 0x233   :  { %v280_v20 = vadd.f32 %v770_v12, %v638_v14  ;;  %v400_v21 = vadd.f32 %v790_v13, %v647_v15 }
 0x234   :  { %v271_v16 = vpop.f32.mrf.mxu0  ;;  %v391_v17 = vpop.f32.mrf.mxu1 }
 0x235   :  { %v272_v24 = vadd.f32 %v638_v14, %v271_v16  ;;  %v392_v25 = vadd.f32 %v647_v15, %v391_v17 }
 0x236   :  { %v771_v18 = vpop.f32.mrf.mxu0  ;;  %v791_v19 = vpop.f32.mrf.mxu1 }
 0x237   :  { %v283_v22 = vadd.f32 %v771_v18, %v638_v14  ;;  %v403_v23 = vadd.f32 %v791_v19, %v647_v15 }
 0x238   :  { %v274_v26 = vpop.f32.mrf.mxu0  ;;  %v394_v27 = vpop.f32.mrf.mxu1 }
 0x239   :  { %v697_v28 = vpack.c.bf16 %v283_v22, %v280_v20  ;;  %v707_v29 = vpack.c.bf16 %v403_v23, %v400_v21  ;;  %v275_v30 = vadd.f32 %v638_v14, %v274_v26  ;;  %v395_v31 = vadd.f32 %v647_v15, %v394_v27 }
 0x23b   :  { %719 = vst [vmem:[#allocation10 + $0x8] sm:$0xff] %v697_v28   ;;  %720 = vst [vmem:[#allocation11 + $0x8] sm:$0xff] %v707_v29   ;;  %v692_v32 = vpack.c.bf16 %v275_v30, %v272_v24  ;;  %v702_v33 = vpack.c.bf16 %v395_v31, %v392_v25 }
 0x23d   :  { %693 = vst [vmem:[#allocation10] sm:$0xff] %v692_v32   ;;  %703 = vst [vmem:[#allocation11] sm:$0xff] %v702_v33  }
 0x23e   :  { %946 = shalt.err (!%p943_p10)
}
 0x23f   :  { %609 = dma.vmem_to_hbm [thread:$0]  %s604_s27, 256, %s1160_s10, [#allocation12], %s1006_s20, %s1006_s20, %s1007_s21  }
 0x240   :  { %s955_s12 = scalar_lea.vmem %s592_s7, 256  ;;  %p960_p12 = scmp.lt.s32.totalorder %s592_s7, %s592_s7 }
 0x241   :  { %p956_p11 = scmp.ne.s32.totalorder %s592_s7, %s955_s12  ;;  %p961_p13 = scmp.lt.s32.totalorder %s955_s12, %s955_s12 }
 0x243   :  { %p962_p0 = por %p961_p13, %p960_p12 }
 0x245   :  { %p963_p1 = pnand %p962_p0, %p956_p11 }
 0x247   :  { %966 = shalt.err (!%p963_p1)
}
 0x248   :  { %597 = dma.vmem_to_hbm [thread:$0]  %s592_s7, 256, %s1159_s9, [#allocation4], %s1006_s20, %s1006_s20, %s1007_s21  }
 0x249   :  { %v656_v35 = vld [vmem:[%s1158_s8] ss:$0 sm:$0xff]  ;;  %s1015_s10 = smov [#allocation13]  }
 0x24a   :  { %s615_s16 = sshll.u32 %s1015_s10, 4  ;;  %s616_s16 = int_to_ptr.vmem [resolvable:$true] %s615_s16 }
 0x24b   :  { %s975_s9 = scalar_lea.vmem %s616_s16, 256  ;;  %p980_p3 = scmp.lt.s32.totalorder %s616_s16, %s616_s16 }
 0x24c   :  { %p976_p2 = scmp.ne.s32.totalorder %s616_s16, %s975_s9  ;;  %p981_p4 = scmp.lt.s32.totalorder %s975_s9, %s975_s9 }
 0x24e   :  { %p982_p5 = por %p981_p4, %p980_p3 }
 0x250   :  { %p983_p6 = pnand %p982_p5, %p976_p2 }
 0x252   :  { %v810_v34 = vpop.f32.mrf.mxu0 }
 0x253   :  { %v520_v38 = vadd.f32 %v810_v34, %v656_v35 }
 0x254   :  { %v511_v36 = vpop.f32.mrf.mxu0 }
 0x255   :  { %v512_v41 = vadd.f32 %v656_v35, %v511_v36 }
 0x256   :  { %v811_v37 = vpop.f32.mrf.mxu0 }
 0x257   :  { %v523_v39 = vadd.f32 %v811_v37, %v656_v35 }
 0x258   :  { %v514_v40 = vpop.f32.mrf.mxu0 }
 0x259   :  { %v717_v42 = vpack.c.bf16 %v523_v39, %v520_v38  ;;  %v515_v43 = vadd.f32 %v656_v35, %v514_v40 }
 0x25b   :  { %721 = vst [vmem:[#allocation13 + $0x8] sm:$0xff] %v717_v42   ;;  %v712_v44 = vpack.c.bf16 %v515_v43, %v512_v41 }
 0x25d   :  { %713 = vst [vmem:[#allocation13] sm:$0xff] %v712_v44  }
 0x25e   :  { %986 = shalt.err (!%p983_p6)
}
 0x25f   :  { %621 = dma.vmem_to_hbm [thread:$0]  %s616_s16, 256, %s1161_s11, [#allocation12], %s1006_s20, %s1006_s20, %s1007_s21  }
 0x260   :  { %1001 = dma.done.wait [#allocation4], 256  }
 0x261   :  { %1002 = vsyncadd [#allocation4], 4294967040 }
 0x262   :  { %1003 = dma.done.wait [#allocation12], 512  }
 0x263   :  { %1004 = vsyncadd [#allocation12], 4294966784 }
 0x264   :  { %631 = vsyncpa [#allocation3], 1 }
 0x265   :  { %632 = vsyncpa [#allocation6], 1 }
 0x266   :  { %633 = vsyncpa [#allocation9], 1 }
 0x267   :  { %634 = vsyncpa [#allocation4], 1 }
 0x268   :  { %635 = vsyncpa [#allocation12], 1 }

</bundles_post_ra>
